<compile_context>
chip_gen: v7x
topology: tpu7x:2x2x1
jax: 0.10.0
libtpu: 0.0.40
codegen_flags: <defaults>
</compile_context>

<pallas_src>
import functools

import numpy as np
import jax
import jax.numpy as jnp
from jax.experimental import pallas as pl
from jax.experimental.pallas import tpu as pltpu


def _round_up(a, b):
    return (a + b - 1) // b * b


def _downsample_kernel(x_ref, o_ref, *, hi, ch):
    # x_ref: (Nb, C, H, W)      o_ref: (Nb, 2C, sz, sz)
    Nb, C, H, W = x_ref.shape
    sz = o_ref.shape[3]
    sz_pad = len(hi)                       # sz rounded up to a sublane multiple
    dtype = x_ref.dtype

    # --- H decimation: pure static sublane gather (rows hi[i]) ---------------
    # Only the needed rows are read from the VMEM block; no arithmetic.
    vh = jnp.concatenate([x_ref[:, :, k:k + 1, :] for k in hi],
                         axis=2)                        # (Nb, C, sz_pad, W)

    # --- W decimation: lane-axis compaction (src column is always 2*j) -------
    # Zero the discarded lanes first so inf/NaN in dropped pixels can never
    # contaminate the result of the one-hot contraction below.
    lane = jax.lax.broadcasted_iota(jnp.int32, vh.shape, dimension=3)
    keep = jnp.logical_and((lane & 1) == 0, lane < 2 * sz)
    vh = jnp.where(keep, vh, 0)

    if jnp.issubdtype(dtype, jnp.floating):
        lhs_dtype = dtype
        # f32 needs HIGHEST so the MXU pass decomposition copies mantissas
        # exactly; bf16 is already exact against a 0/1 operand.
        prec = (jax.lax.Precision.HIGHEST if dtype == jnp.float32
                else jax.lax.Precision.DEFAULT)
    else:
        # TODO(synk): integer inputs go through f32 (exact for |x| < 2^24);
        # a true lane gather would avoid this but has no clean Pallas lowering.
        lhs_dtype = jnp.float32
        prec = jax.lax.Precision.HIGHEST

    # Exact one-hot (W, sz) selection matrix built from iota (no HBM constant).
    w_idx = jax.lax.broadcasted_iota(jnp.int32, (W, sz), 0)
    j_idx = jax.lax.broadcasted_iota(jnp.int32, (W, sz), 1)
    sel = (w_idx == 2 * j_idx).astype(lhs_dtype)

    # Fold (Nb, C, sz_pad) into M so the single tiny matmul has a useful M dim.
    lhs = vh.astype(lhs_dtype).reshape(Nb * C * sz_pad, W)
    y = jnp.dot(lhs, sel, precision=prec,
                preferred_element_type=jnp.float32)     # (Nb*C*sz_pad, sz)
    y = y.reshape(Nb, C, sz_pad, sz)[:, :, :sz, :].astype(o_ref.dtype)

    # --- channel concat with zeros: each region written exactly once ---------
    # TODO(synk): minor dim sz (<128 for small maps) makes these masked stores;
    # only restructure to a lane-merged output view if a bundle dump shows the
    # vst slot binding.
    if ch > 0:
        o_ref[:, :ch, :, :] = jnp.zeros((Nb, ch, sz, sz), o_ref.dtype)
    o_ref[:, ch:ch + C, :, :] = y
    o_ref[:, ch + C:, :, :] = jnp.zeros((Nb, C - ch, sz, sz), o_ref.dtype)


@jax.jit
def downsample(x):
    """x: (N, C, H, W) -> (N, 2C, W//2, W//2); matches Downsample.forward."""
    N, C, H, W = x.shape
    sz = W // 2
    assert sz >= 1, "Downsample needs W >= 2"
    ch = C // 2
    C2 = 2 * C
    itemsize = x.dtype.itemsize

    # Static nearest-neighbour row sources (F.interpolate 'nearest':
    # src = floor(dst * in / out)), padded to a sublane multiple so the
    # in-kernel (Nb, C, sz, W) -> (Nb*C*sz, W) fold is tile-aligned.
    sz_pad = _round_up(sz, 8)
    hi = tuple(int((i * H) // sz) for i in range(sz))
    hi = hi + (hi[-1],) * (sz_pad - sz)

    # ---- samples per grid step ----------------------------------------------
    # Batch samples so each step moves a few hundred KiB (amortizes the
    # ~0.35us per-step pipeline overhead), but keep >= 2 grid steps when N >= 2
    # so dimension_semantics=("parallel",) can spread work over both v7x TCs.
    blk_in_per_sample = C * _round_up(H, 8) * _round_up(W, 128) * itemsize
    blk_out_per_sample = C2 * _round_up(sz, 8) * _round_up(sz, 128) * itemsize
    per_sample = blk_in_per_sample + blk_out_per_sample
    nb_cap = max(1, (512 * 1024) // per_sample)
    if N >= 2:
        nb_cap = min(nb_cap, N // 2)
    nb_cap = min(max(nb_cap, 1), N)
    Nb = max(d for d in range(1, nb_cap + 1) if N % d == 0)

    # ---- generation-aware VMEM budget ---------------------------------------
    blk_in = Nb * blk_in_per_sample
    blk_out = Nb * blk_out_per_sample
    # double-buffered pipeline blocks + in-kernel temporaries + slack
    need = 2 * (blk_in + blk_out) + 4 * blk_in + blk_out + (1 << 20)
    try:
        phys = pltpu.get_tpu_info().vmem_capacity_bytes
    except Exception:
        phys = 64 * 2 ** 20        # v7x has the smallest physical VMEM per TC
    vmem_limit = int(min(max(2 * need, 32 * 2 ** 20), (phys * 3) // 4))
    # TODO(synk): for feature maps too large for one (Nb, C, H, W) block, tile
    # H and read only the needed rows with a sublane-strided manual DMA.

    kernel = functools.partial(_downsample_kernel, hi=hi, ch=ch)

    out = pl.pallas_call(
        kernel,
        out_shape=jax.ShapeDtypeStruct((N, C2, sz, sz), x.dtype),
        grid_spec=pltpu.PrefetchScalarGridSpec(
            num_scalar_prefetch=0,
            grid=(N // Nb,),                              # one step per Nb samples
            in_specs=[pl.BlockSpec((Nb, C, H, W), lambda n: (n, 0, 0, 0))],
            out_specs=pl.BlockSpec((Nb, C2, sz, sz), lambda n: (n, 0, 0, 0)),
        ),
        compiler_params=pltpu.CompilerParams(
            dimension_semantics=("parallel",),
            vmem_limit_bytes=vmem_limit,
        ),
        cost_estimate=pl.CostEstimate(
            flops=2 * N * C * sz * W * sz,                # tiny one-hot contraction
            transcendentals=0,
            bytes_accessed=(N * C * H * W + N * C2 * sz * sz) * itemsize,
        ),
    )(x)
    return out


def _reference(x):
    # pure-JAX oracle with identical semantics (general H, W)
    N, C, H, W = x.shape
    sz, ch = W // 2, C // 2
    hi = (np.arange(sz) * H) // sz
    wi = (np.arange(sz) * W) // sz
    ds = x[:, :, hi, :][:, :, :, wi]
    return jnp.concatenate(
        [jnp.zeros((N, ch, sz, sz), x.dtype),
         ds,
         jnp.zeros((N, C - ch, sz, sz), x.dtype)], axis=1)


if __name__ == "__main__":
    key = jax.random.PRNGKey(0)
    k1, k2 = jax.random.split(key)

    # primary case (square, even feature map -- the module's typical use)
    N, C, H, W = 2, 4, 16, 16
    x = jax.random.normal(k1, (N, C, H, W), dtype=jnp.float32)
    out = jax.block_until_ready(downsample(x))
    ref = _reference(x)
    assert out.shape == (N, 2 * C, W // 2, W // 2), out.shape
    assert out.dtype == x.dtype
    assert jnp.allclose(out, ref, rtol=1e-6, atol=1e-6), \
        float(jnp.max(jnp.abs(out - ref)))

    # non-square case (H != W) exercises the non-uniform row gather
    x2 = jax.random.normal(k2, (2, 4, 12, 16), dtype=jnp.float32)
    out2 = jax.block_until_ready(downsample(x2))
    ref2 = _reference(x2)
    assert out2.shape == (2, 8, 8, 8), out2.shape
    assert jnp.allclose(out2, ref2, rtol=1e-6, atol=1e-6), \
        float(jnp.max(jnp.abs(out2 - ref2)))

    print("KERNEL_OK")
</pallas_src>

<mosaic_0001>
module attributes {stable_mosaic.version = 11 : i64} {
  func.func @_downsample_kernel(%arg0: i32, %arg1: memref<1x4x16x16xf32, #tpu.memory_space<vmem>>, %arg2: memref<1x8x8x8xf32, #tpu.memory_space<vmem>>) attributes {dimension_semantics = [#tpu.dimension_semantics<parallel>], iteration_bounds = array<i64: 2>, scalar_prefetch = 0 : i64, scratch_operands = 0 : i64, tpu.core_type = #tpu.core_type<tc>, window_params = [{transform_indices = @transform_0, window_bounds = array<i64: 1, 4, 16, 16>}, {transform_indices = @transform_1, window_bounds = array<i64: 1, 8, 8, 8>}]} {
    %c0 = arith.constant 0 : index
    %c0_0 = arith.constant 0 : index
    %c0_1 = arith.constant 0 : index
    %c0_2 = arith.constant 0 : index
    %0 = vector.load %arg1[%c0, %c0_0, %c0_1, %c0_2] : memref<1x4x16x16xf32, #tpu.memory_space<vmem>>, vector<1x4x1x16xf32>
    %c0_3 = arith.constant 0 : index
    %c0_4 = arith.constant 0 : index
    %c2 = arith.constant 2 : index
    %c0_5 = arith.constant 0 : index
    %1 = vector.load %arg1[%c0_3, %c0_4, %c2, %c0_5] : memref<1x4x16x16xf32, #tpu.memory_space<vmem>>, vector<1x4x1x16xf32>
    %c0_6 = arith.constant 0 : index
    %c0_7 = arith.constant 0 : index
    %c4 = arith.constant 4 : index
    %c0_8 = arith.constant 0 : index
    %2 = vector.load %arg1[%c0_6, %c0_7, %c4, %c0_8] : memref<1x4x16x16xf32, #tpu.memory_space<vmem>>, vector<1x4x1x16xf32>
    %c0_9 = arith.constant 0 : index
    %c0_10 = arith.constant 0 : index
    %c6 = arith.constant 6 : index
    %c0_11 = arith.constant 0 : index
    %3 = vector.load %arg1[%c0_9, %c0_10, %c6, %c0_11] : memref<1x4x16x16xf32, #tpu.memory_space<vmem>>, vector<1x4x1x16xf32>
    %c0_12 = arith.constant 0 : index
    %c0_13 = arith.constant 0 : index
    %c8 = arith.constant 8 : index
    %c0_14 = arith.constant 0 : index
    %4 = vector.load %arg1[%c0_12, %c0_13, %c8, %c0_14] : memref<1x4x16x16xf32, #tpu.memory_space<vmem>>, vector<1x4x1x16xf32>
    %c0_15 = arith.constant 0 : index
    %c0_16 = arith.constant 0 : index
    %c10 = arith.constant 10 : index
    %c0_17 = arith.constant 0 : index
    %5 = vector.load %arg1[%c0_15, %c0_16, %c10, %c0_17] : memref<1x4x16x16xf32, #tpu.memory_space<vmem>>, vector<1x4x1x16xf32>
    %c0_18 = arith.constant 0 : index
    %c0_19 = arith.constant 0 : index
    %c12 = arith.constant 12 : index
    %c0_20 = arith.constant 0 : index
    %6 = vector.load %arg1[%c0_18, %c0_19, %c12, %c0_20] : memref<1x4x16x16xf32, #tpu.memory_space<vmem>>, vector<1x4x1x16xf32>
    %c0_21 = arith.constant 0 : index
    %c0_22 = arith.constant 0 : index
    %c14 = arith.constant 14 : index
    %c0_23 = arith.constant 0 : index
    %7 = vector.load %arg1[%c0_21, %c0_22, %c14, %c0_23] : memref<1x4x16x16xf32, #tpu.memory_space<vmem>>, vector<1x4x1x16xf32>
    %8 = tpu.concatenate %0, %1, %2, %3, %4, %5, %6, %7 in 2 : vector<1x4x1x16xf32>, vector<1x4x1x16xf32>, vector<1x4x1x16xf32>, vector<1x4x1x16xf32>, vector<1x4x1x16xf32>, vector<1x4x1x16xf32>, vector<1x4x1x16xf32>, vector<1x4x1x16xf32> -> vector<1x4x8x16xf32>
    %9 = tpu.iota {dimensions = array<i32: 3>} : vector<1x4x8x16xi32>
    %c1_i32 = arith.constant 1 : i32
    %10 = vector.broadcast %c1_i32 : i32 to vector<1x4x8x16xi32>
    %11 = arith.andi %9, %10 : vector<1x4x8x16xi32>
    %c0_i32 = arith.constant 0 : i32
    %12 = vector.broadcast %c0_i32 : i32 to vector<1x4x8x16xi32>
    %13 = arith.cmpi eq, %11, %12 : vector<1x4x8x16xi32>
    %c16_i32 = arith.constant 16 : i32
    %14 = vector.broadcast %c16_i32 : i32 to vector<1x4x8x16xi32>
    %15 = arith.cmpi slt, %9, %14 : vector<1x4x8x16xi32>
    %16 = arith.andi %13, %15 : vector<1x4x8x16xi1>
    %c0_i32_24 = arith.constant 0 : i32
    %17 = arith.sitofp %c0_i32_24 : i32 to f32
    %18 = vector.broadcast %17 : f32 to vector<1x4x8x16xf32>
    %19 = arith.select %16, %8, %18 : vector<1x4x8x16xi1>, vector<1x4x8x16xf32>
    %20 = tpu.iota {dimensions = array<i32: 0>} : vector<16x8xi32>
    %21 = tpu.iota {dimensions = array<i32: 1>} : vector<16x8xi32>
    %c2_i32 = arith.constant 2 : i32
    %22 = vector.broadcast %c2_i32 : i32 to vector<16x8xi32>
    %23 = arith.muli %22, %21 : vector<16x8xi32>
    %24 = arith.cmpi eq, %20, %23 : vector<16x8xi32>
    %25 = arith.extui %24 : vector<16x8xi1> to vector<16x8xi32>
    %26 = arith.sitofp %25 : vector<16x8xi32> to vector<16x8xf32>
    %27 = vector.shape_cast %19 : vector<1x4x8x16xf32> to vector<32x16xf32>
    %cst = arith.constant dense<0.000000e+00> : vector<32x8xf32>
    %28 = tpu.matmul %27, %26, %cst {dimension_numbers = #tpu.dot_dimension_numbers<[1], [0], [0], [1], [0, 0, 1, 1], [], []>, precision = #tpu.contract_precision<fp32>} : vector<32x16xf32>, vector<16x8xf32>, vector<32x8xf32> -> vector<32x8xf32>
    %29 = vector.shape_cast %28 : vector<32x8xf32> to vector<1x4x8x8xf32>
    %cst_25 = arith.constant 0.000000e+00 : f32
    %30 = vector.broadcast %cst_25 : f32 to vector<1x2x8x8xf32>
    %c0_26 = arith.constant 0 : index
    %c0_27 = arith.constant 0 : index
    %c0_28 = arith.constant 0 : index
    %c0_29 = arith.constant 0 : index
    %31 = vector.load %arg2[%c0_26, %c0_27, %c0_28, %c0_29] : memref<1x8x8x8xf32, #tpu.memory_space<vmem>>, vector<1x2x8x8xf32>
    tpu.vector_store %arg2[%c0_26, %c0_27, %c0_28, %c0_29], %30 {strides = array<i32>} : memref<1x8x8x8xf32, #tpu.memory_space<vmem>>, vector<1x2x8x8xf32>,
    %c0_30 = arith.constant 0 : index
    %c2_31 = arith.constant 2 : index
    %c0_32 = arith.constant 0 : index
    %c0_33 = arith.constant 0 : index
    %32 = vector.load %arg2[%c0_30, %c2_31, %c0_32, %c0_33] : memref<1x8x8x8xf32, #tpu.memory_space<vmem>>, vector<1x4x8x8xf32>
    tpu.vector_store %arg2[%c0_30, %c2_31, %c0_32, %c0_33], %29 {strides = array<i32>} : memref<1x8x8x8xf32, #tpu.memory_space<vmem>>, vector<1x4x8x8xf32>,
    %cst_34 = arith.constant 0.000000e+00 : f32
    %33 = vector.broadcast %cst_34 : f32 to vector<1x2x8x8xf32>
    %c0_35 = arith.constant 0 : index
    %c6_36 = arith.constant 6 : index
    %c0_37 = arith.constant 0 : index
    %c0_38 = arith.constant 0 : index
    %34 = vector.load %arg2[%c0_35, %c6_36, %c0_37, %c0_38] : memref<1x8x8x8xf32, #tpu.memory_space<vmem>>, vector<1x2x8x8xf32>
    tpu.vector_store %arg2[%c0_35, %c6_36, %c0_37, %c0_38], %33 {strides = array<i32>} : memref<1x8x8x8xf32, #tpu.memory_space<vmem>>, vector<1x2x8x8xf32>,
    return
  }
  func.func @transform_0(%arg0: i32) -> (i32, i32, i32, i32) {
    %c0_i32 = arith.constant 0 : i32
    %c0_i32_0 = arith.constant 0 : i32
    %c0_i32_1 = arith.constant 0 : i32
    %c0_i32_2 = arith.constant 0 : i32
    return %arg0, %c0_i32, %c0_i32_0, %c0_i32_1 : i32, i32, i32, i32
  }
  func.func @transform_1(%arg0: i32) -> (i32, i32, i32, i32) {
    %c0_i32 = arith.constant 0 : i32
    %c0_i32_0 = arith.constant 0 : i32
    %c0_i32_1 = arith.constant 0 : i32
    %c0_i32_2 = arith.constant 0 : i32
    return %arg0, %c0_i32, %c0_i32_0, %c0_i32_1 : i32, i32, i32, i32
  }
}

</mosaic_0001>

<bundles_post_ra>
// kernel: downsample.1
= control target key start
LH: loop header
LB: loop body
LE: loop exit
PB: predicated region body
PF: predicated region fallthrough
CT: control target
= control target key end

     0   :  { %6 = vsyncpa [#allocation3], 0  ;;  %s1663_s0 = inlined_call_operand.hbm [shape: f32[2,4,16,16], index: 0, kind: input, shape index: {}]   ;;  %s1664_s1 = inlined_call_operand.hbm [shape: f32[2,8,8,8], index: 1, kind: output, shape index: {}]  }
   0x1   :  { %8 = vsyncpa [#allocation3 + $0x1], 0 }
   0x2   :  { %9 = vsyncpa [#allocation4], 0 }
   0x3   :  { %11 = vsyncpa [#allocation4 + $0x1], 0  ;;  %s1343_s6 = smov 0   ;;  %s1345_s7 = smov 0  }
   0x4   :  { %s1347_s8 = smov 0   ;;  %s1349_s9 = smov 0  }
   0x5 LB: > { %s1364_s10 = sadd.s32 4294967295, %s1323_s9   ;;  %s1005_s11 = sadd.s32 4294967294, %s1323_s9   ;;  %s1323_s9 = sphi %s1349_s9, %s1683_s9   ;;  %s1319_s8 = sphi %s1347_s8, %s1682_s8   ;;  %s1315_s7 = sphi %s1345_s7, %s1681_s7   ;;  %s1311_s6 = sphi %s1343_s6, %s1680_s6  }
   0x6   : > { %s1368_s12 = sadd.s32 1, %s1323_s9   ;;  %s24_s13 = sadd.s32 1, %s1319_s8 }
   0x7   : > { %s21_s14 = ssub.s32 %s1323_s9, %s1368_s12  ;;  %p31_p0 = scmp.ne.s32.totalorder %s1319_s8, %s1315_s7 }
   0x8   : > { %p22_p1 = scmp.eq.s32.totalorder %s21_s14, 0  ;;  %p32_p2 = scmp.eq.s32.totalorder %s1323_s9, 0 }
   0x9   : > { %p37_p3 = scmp.ne.s32.totalorder %s1315_s7, %s1311_s6  ;;  %p38_p4 = scmp.eq.s32.totalorder %s1364_s10, 0 }
   0xa   : > { %s1380_s15 = scalar_select %p22_p1, %s1319_s8, %s24_s13  }
   0xb   : > { %p1382_p5 = por %p32_p2, %p31_p0  ;;  %p1386_p6 = por %p38_p4, %p37_p3 }
   0xc   : > { %p61_p7 = scmp.eq.s32.totalorder %s1364_s10, 1  ;;  %p67_p8 = scmp.eq.s32.totalorder %s1005_s11, 1 }
   0xd   : > { %p1187_p10 = scmp.lt.s32.totalorder %s1323_s9, 2  ;;  %s87_s20 = sand.u32 1, %s1319_s8  }
   0xe   : > { %p1393_p11 = por %p61_p7, %p31_p0  ;;  %p1397_p12 = por %p67_p8, %p37_p3 }
   0xf   : > { %s1033_s21 = sshll.u32 %s1323_s9, 10  ;;  %s1008_s22 = sshll.u32 %s87_s20, 6 }
  0x10   : > { %s1668_s18 = scalar_select %p1393_p11, 1, 0 }
  0x11   : > { %s1669_s19 = scalar_select %p1397_p12, 1, 0 }
  0x12   : > { %s1406_s25 = scalar_lea.hbm %s1663_s0, %s1033_s21  ;;  %s91_s26 = scalar_lea.vmem [#allocation2], %s1008_s22 }
  0x13   : > { %s98_s27 = sshll.u32 %s91_s26, 4  ;;  %p1410_p13 = pnand %p1187_p10, %p1382_p5  ;;  %s1414_s27 = int_to_ptr.vmem [resolvable:$true] %s98_s27 }
  0x14   : > { %s1416_s29 = scalar_lea.sflag [#allocation3], %s87_s20  ;;  %s1227_s30 = scalar_lea.hbm %s1406_s25, 1024 }
  0x15   : > { %p1228_p0 = scmp.ne.s32.totalorder %s1406_s25, %s1227_s30  ;;  %p1229_p1 = pneg %p1410_p13 }
  0x16   : > { %s1232_s4 = scalar_lea.hbm %s1663_s0, 2048  ;;  %p1233_p4 = scmp.lt.u32.totalorder %s1406_s25, %s1663_s0 }
  0x17   : > { %p1230_p2 = pnand %p1229_p1, %p1228_p0  ;;  %p1234_p5 = scmp.lt.u32.totalorder %s1232_s4, %s1227_s30 }
  0x18   : > { %p1236_p8 = scmp.lt.u32.totalorder %s1227_s30, %s1406_s25 }
  0x19   : > { %p1231_p3 = pneg %p1230_p2  ;;  %p1235_p7 = por %p1234_p5, %p1233_p4 }
  0x1b   : > { %p1237_p10 = por %p1236_p8, %p1235_p7 }
  0x1d   : > { %p1238_p9 = pnand %p1237_p10, %p1231_p3 }
  0x1f   : > { %1241 = shalt.err (!%p1238_p9)
}
  0x20   : > { %s1242_s13 = scalar_lea.vmem %s1414_s27, 1024  ;;  %s1325_s14 = smov [#allocation2]  }
  0x21   : > { %p1243_p0 = scmp.ne.s32.totalorder %s1414_s27, %s1242_s13  ;;  %s1247_s16 = sshll.u32 %s1325_s14, 4  ;;  %s1248_s16 = int_to_ptr.vmem [resolvable:$false] %s1247_s16 }
  0x22   : > { %s1249_s20 = scalar_lea.vmem %s1248_s16, 2048  ;;  %p1250_p11 = scmp.lt.s32.totalorder %s1414_s27, %s1248_s16 }
  0x23   : > { %p1245_p2 = pnand %p1243_p0, %p1229_p1  ;;  %p1251_p4 = scmp.lt.s32.totalorder %s1249_s20, %s1242_s13 }
  0x25   : > { %p1246_p12 = pneg %p1245_p2  ;;  %p1252_p5 = por %p1251_p4, %p1250_p11 }
  0x27   : > { %p1253_p7 = pnand %p1252_p5, %p1246_p12 }
  0x29   : > { %1256 = shalt.err (!%p1253_p7)
}
  0x2a   : > { %s1326_s21 = smov 128   ;;  %s1327_s22 = smov 8  }
  0x2b   : > { %1182 = dma.hbm_to_vmem [thread:$0]  (!%p1410_p13), %s1406_s25, 1024, %s1414_s27, %s1416_s29, %s1326_s21, %s1326_s21, %s1327_s22  }
  0x2c   : > { %p1011_p9 = scmp.ge.s32.totalorder %s1323_s9, 1  ;;  %p106_p1 = scmp.lt.s32.totalorder %s1323_s9, 3 }
  0x2e   : > { %p107_p3 = pnand %p1011_p9, %p106_p1 }
  0x2f   : > { %s1447_s23 = sand.u32 (!%p107_p3), 1, %s1315_s7  }
  0x30   : > { %110 = sbr.rel (%p107_p3) target bundleno = 344 (0x158), region = 24  ;;  %s1012_s24 = sshll.u32 (!%p107_p3), %s1447_s23, 6 }
  0x31   : > { %s113_s26 = scalar_lea.sflag (!%p107_p3), [#allocation3], %s1447_s23  ;;  %s1453_s30 = scalar_lea.vmem (!%p107_p3), [#allocation2], %s1012_s24 }
  0x37   : > { %1302 = dma.done.wait (%p1386_p6), %s113_s26, 1024  }
  0x38   : > { %1304 = vsyncadd (%p1386_p6), %s113_s26, 4294966272  ;;  %v286_v0 = vlaneseq  ;;  %vm251_vm0 = vcmask 1040384   ;;  %vm256_vm1 = vcmask 1041408   ;;  %vm261_vm2 = vcmask 1042432   ;;  %v135_v11 = vld [vmem:[%s1453_s30] sm:$0x1] }
  0x39   : > { %vm266_vm3 = vcmask 1043456   ;;  %vm271_vm4 = vcmask 1044480   ;;  %vm276_vm7 = vcmask 1045504   ;;  %v1328_v7 = vmov 0.0   ;;  %v139_v12 = vld [vmem:[%s1453_s30 + $0x2] sm:$0x1] }
  0x3a   : > { %v1459_v1 = vand.u32 127, %v286_v0  ;;  %v297_v2 = vshrl.u32 %v286_v0, 7  ;;  %vm281_vm11 = vcmask 1046528   ;;  %v1329_v14 = vmov 1.0|1.0   ;;  %s134_s17 = scalar_lea.vmem [#allocation5], %s1012_s24 }
  0x3b   : > { %v143_v15 = vld [vmem:[%s1453_s30 + $0x4] sm:$0x1]  ;;  %v147_v16 = vld [vmem:[%s1453_s30 + $0x6] sm:$0x1]  ;;  %v151_v17 = vld [vmem:[%s1453_s30 + $0x8] sm:$0x1] }
  0x3c   : > { %v298_v3 = vadd.s32 8, %v297_v2  ;;  %v299_v4 = vmul.u32 2, %v1459_v1  ;;  %v288_v5 = vand.u32 1, %v1459_v1  ;;  %vm290_vm9 = vcmp.lt.s32.totalorder %v1459_v1, 16  ;;  %v155_v18 = vld [vmem:[%s1453_s30 + $0xa] sm:$0x1] }
  0x3d   : > { %v159_v19 = vld [vmem:[%s1453_s30 + $0xc] sm:$0x1]  ;;  %v163_v20 = vld [vmem:[%s1453_s30 + $0xe] sm:$0x1]  ;;  %v171_v21 = vrot.slane %v139_v12, 7  ;;  %v183_v22 = vrot.slane %v143_v15, 6 }
  0x3e   : > { %vm300_vm5 = vcmp.eq.s32.totalorder %v297_v2, %v299_v4  ;;  %vm301_vm6 = vcmp.eq.s32.totalorder %v298_v3, %v299_v4  ;;  %vm1463_vm8 = vcmp.eq.s32.totalorder %v288_v5, 0  ;;  %v195_v23 = vrot.slane %v147_v16, 5  ;;  %v136_v28 = vld [vmem:[%s1453_s30 + $0x10] sm:$0x1]  ;;  %v140_v29 = vld [vmem:[%s1453_s30 + $0x12] sm:$0x1] }
  0x3f   : > { %v1014_v8 = vsel %vm300_vm5, 1.0, %v1328_v7  ;;  %v1015_v9 = vsel %vm301_vm6, 1.0, %v1328_v7  ;;  %vm1470_vm10 = vmpackc.low %vm301_vm6, %vm300_vm5  ;;  %v207_v24 = vrot.slane %v151_v17, 4  ;;  %v219_v25 = vrot.slane %v155_v18, 3  ;;  %v144_v32 = vld [vmem:[%s1453_s30 + $0x14] sm:$0x1] }
  0x40   : > { %v1476_v13 = vsub.f32 %v1014_v8, %v1014_v8  ;;  %1144 = vmatprep.subr.msk.bf16.mxu0 %vm1470_vm10, %v1329_v14  ;;  %1132 = vmatprep.subr.msk.bf16.mxu1 %vm1470_vm10, %v1329_v14  ;;  %v231_v26 = vrot.slane %v159_v19, 2  ;;  %v243_v27 = vrot.slane %v163_v20, 1  ;;  %v252_v31 = vsel %vm251_vm0, %v135_v11, %v171_v21  ;;  %v148_v33 = vld [vmem:[%s1453_s30 + $0x16] sm:$0x1]  ;;  %v152_v34 = vld [vmem:[%s1453_s30 + $0x18] sm:$0x1]  ;;  %vm1518_vm13 = vmand %vm1463_vm8, %vm290_vm9 }
  0x41   : > { %1146 = vmatpush3.bf16.msk.msra.mxu0 %vm1470_vm10, %v1329_v14  ;;  %1134 = vmatpush3.bf16.msk.msra.mxu1 %vm1470_vm10, %v1329_v14  ;;  %v1503_v35 = vsub.f32 %v1015_v9, %v1015_v9  ;;  %v257_v36 = vsel %vm256_vm1, %v252_v31, %v183_v22  ;;  %v156_v37 = vld [vmem:[%s1453_s30 + $0x1a] sm:$0x1]  ;;  %v160_v38 = vld [vmem:[%s1453_s30 + $0x1c] sm:$0x1]  ;;  %v164_v39 = vld [vmem:[%s1453_s30 + $0x1e] sm:$0x1] }
  0x42   : > { %v429_v30 = vand.u32 4294901760, %v1476_v13  ;;  %v262_v41 = vsel %vm261_vm2, %v257_v36, %v195_v23  ;;  %v172_v42 = vrot.slane %v140_v29, 7  ;;  %v184_v43 = vrot.slane %v144_v32, 6  ;;  %v141_v48 = vld [vmem:[%s1453_s30 + $0x22] sm:$0x1]  ;;  %s1034_s25 = sshll.u32 %s1364_s10, 10 }
  0x43   : > { %v196_v44 = vrot.slane %v148_v33, 5  ;;  %v267_v45 = vsel %vm266_vm3, %v262_v41, %v207_v24  ;;  %vm306_vm12 = vcmask 130048   ;;  %v208_v46 = vrot.slane %v152_v34, 4  ;;  %v145_v54 = vld [vmem:[%s1453_s30 + $0x24] sm:$0x1]  ;;  %s932_s27 = sshll.u32 %s134_s17, 4  ;;  %s1615_s2 = scalar_lea.hbm %s1664_s1, %s1034_s25  ;;  %s1617_s27 = int_to_ptr.vmem [resolvable:$true] %s932_s27 }
  0x44   : > { %v430_v40 = vsub.f32 %v1476_v13, %v429_v30  ;;  %v220_v47 = vrot.slane %v156_v37, 3  ;;  %v272_v49 = vsel %vm271_vm4, %v267_v45, %v219_v25  ;;  %v232_v51 = vrot.slane %v160_v38, 2  ;;  %v149_v55 = vld [vmem:[%s1453_s30 + $0x26] sm:$0x1]  ;;  %v153_v60 = vld [vmem:[%s1453_s30 + $0x28] sm:$0x1] }
  0x45   : > { %v244_v52 = vrot.slane %v164_v39, 1  ;;  %v253_v53 = vsel %vm251_vm0, %v136_v28, %v172_v42  ;;  %v277_v56 = vsel %vm276_vm7, %v272_v49, %v231_v26  ;;  %v436_v59 = vand.u32 4294901760, %v1503_v35  ;;  %v157_v61 = vld [vmem:[%s1453_s30 + $0x2a] sm:$0x1]  ;;  %v161_v0 = vld [vmem:[%s1453_s30 + $0x2c] sm:$0x1] }
  0x46   : > { %v258_v57 = vsel %vm256_vm1, %v253_v53, %v184_v43  ;;  %v431_v58 = vand.u32 4294901760, %v430_v40  ;;  %v282_v62 = vsel %vm281_vm11, %v277_v56, %v243_v27  ;;  %v173_v1 = vrot.slane %v141_v48, 7  ;;  %v137_v6 = vld [vmem:[%s1453_s30 + $0x20] sm:$0x1]  ;;  %v165_v8 = vld [vmem:[%s1453_s30 + $0x2e] sm:$0x1] }
  0x47   : > { %v263_v63 = vsel %vm261_vm2, %v258_v57, %v196_v44  ;;  %v185_v2 = vrot.slane %v145_v54, 6  ;;  %v292_v3 = vsel %vm1518_vm13, %v282_v62, 0.0  ;;  %v437_v5 = vsub.f32 %v1503_v35, %v436_v59  ;;  %v142_v21 = vld [vmem:[%s1453_s30 + $0x32] sm:$0x1]  ;;  %v146_v26 = vld [vmem:[%s1453_s30 + $0x34] sm:$0x1] }
  0x48   : > { %v268_v4 = vsel %vm266_vm3, %v263_v63, %v208_v46  ;;  %v197_v9 = vrot.slane %v149_v55, 5  ;;  %v308_v11 = vsel %vm306_vm12, %v292_v3, 0  ;;  %v209_v15 = vrot.slane %v153_v60, 4  ;;  %v138_v32 = vld [vmem:[%s1453_s30 + $0x30] sm:$0x1]  ;;  %s919_s10 = scalar_lea.sflag [#allocation4], %s1447_s23 }
  0x49   : > { %v273_v12 = vsel %vm271_vm4, %v268_v4, %v220_v47  ;;  %v221_v16 = vrot.slane %v157_v61, 3  ;;  %v1541_v17 = vand.u32 4294901760, %v308_v11  ;;  %v438_v19 = vand.u32 4294901760, %v437_v5  ;;  %v150_v33 = vld [vmem:[%s1453_s30 + $0x36] sm:$0x1]  ;;  %s1257_s3 = scalar_lea.vmem %s1617_s27, 1024 }
  0x4a   : > { %v278_v18 = vsel %vm276_vm7, %v273_v12, %v232_v51  ;;  %v233_v20 = vrot.slane %v161_v0, 2  ;;  %v245_v23 = vrot.slane %v165_v8, 1  ;;  %v254_v24 = vsel %vm251_vm0, %v137_v6, %v173_v1  ;;  %v158_v37 = vld [vmem:[%s1453_s30 + $0x3a] sm:$0x1]  ;;  %v162_v42 = vld [vmem:[%s1453_s30 + $0x3c] sm:$0x1]  ;;  %p1258_p6 = scmp.ne.s32.totalorder %s1617_s27, %s1257_s3 }
  0x4b   : > { %v283_v22 = vsel %vm281_vm11, %v278_v18, %v244_v52  ;;  %v1147_v25 = vpack.c.bf16 %v436_v59, %v429_v30  ;;  %v1549_v27 = vsub.f32 %v308_v11, %v1541_v17  ;;  %v1135_v29 = vpack.c.bf16 %v438_v19, %v431_v58  ;;  %v154_v30 = vld [vmem:[%s1453_s30 + $0x38] sm:$0x1]  ;;  %v166_v49 = vld [vmem:[%s1453_s30 + $0x3e] sm:$0x1]  ;;  %p1677_p11 = scmp.ne.s32.totalorder %s1668_s18, 0  ;;  %s1330_s4 = smov [#allocation5]  }
  0x4c   : > { %v293_v28 = vsel %vm1518_vm13, %v283_v22, 0.0  ;;  %v259_v31 = vsel %vm256_vm1, %v254_v24, %v185_v2  ;;  %v174_v38 = vrot.slane %v142_v21, 7  ;;  %v186_v43 = vrot.slane %v146_v26, 6  ;;  %s1261_s5 = sshll.u32 %s1330_s4, 4  ;;  %s1262_s5 = int_to_ptr.vmem [resolvable:$false] %s1261_s5 }
  0x4d   : > { %v311_v34 = vsel %vm306_vm12, %v293_v28, 0  ;;  %v264_v36 = vsel %vm261_vm2, %v259_v31, %v197_v9  ;;  %1148 = vmatprep.subr.bf16.mxu0 %v1147_v25  ;;  %v388_v39 = vand.u32 4294901760, %v1549_v27  ;;  %1136 = vmatprep.subr.bf16.mxu1 %v1135_v29  ;;  %v198_v45 = vrot.slane %v150_v33, 5  ;;  %p1259_p12 = pnand %p1258_p6, %p1677_p11  ;;  %s1263_s11 = scalar_lea.vmem %s1262_s5, 2048 }
  0x4e   : > { %v1561_v40 = vand.u32 4294901760, %v311_v34  ;;  %v269_v41 = vsel %vm266_vm3, %v264_v36, %v209_v15  ;;  %v210_v51 = vrot.slane %v154_v30, 4  ;;  %v222_v53 = vrot.slane %v158_v37, 3  ;;  %p1264_p8 = scmp.lt.s32.totalorder %s1617_s27, %s1262_s5  ;;  %p1265_p10 = scmp.lt.s32.totalorder %s1263_s11, %s1257_s3 }
  0x4f   : > { %v274_v44 = vsel %vm271_vm4, %v269_v41, %v221_v16  ;;  %1105 = vmatprep.mubr.f32.mxu0 %v388_v39  ;;  %v389_v47 = vsub.f32 %v1549_v27, %v388_v39  ;;  %v234_v54 = vrot.slane %v162_v42, 2  ;;  %v255_v55 = vsel %vm251_vm0, %v138_v32, %v174_v38  ;;  %p1260_p13 = pneg %p1259_p12 }
  0x50   : > { %v397_v46 = vsub.f32 %v311_v34, %v1561_v40  ;;  %v279_v48 = vsel %vm276_vm7, %v274_v44, %v233_v20  ;;  %v260_v59 = vsel %vm256_vm1, %v255_v55, %v186_v43  ;;  %v246_v61 = vrot.slane %v166_v49, 1  ;;  %p1266_p0 = por %p1265_p10, %p1264_p8 }
  0x51   : > { %v284_v52 = vsel %vm281_vm11, %v279_v48, %v245_v23  ;;  %v390_v57 = vand.u32 4294901760, %v389_v47  ;;  %v265_v62 = vsel %vm261_vm2, %v260_v59, %v198_v45  ;;  %v1139_v6 = vpack.c.bf16 %v1503_v35, %v1476_v13 }
  0x52   : > { %v398_v56 = vand.u32 4294901760, %v397_v46  ;;  %v294_v58 = vsel %vm1518_vm13, %v284_v52, 0.0  ;;  %v270_v1 = vsel %vm266_vm3, %v265_v62, %v210_v51  ;;  %vm907_vm14 = vcmask 64512   ;;  %p1267_p2 = pnand %p1266_p0, %p1260_p13 }
  0x53   : > { %v314_v60 = vsel %vm306_vm12, %v294_v58, 0  ;;  %1075 = vmatprep.mubr.f32.mxu1 %v390_v57  ;;  %v275_v2 = vsel %vm271_vm4, %v270_v1, %v222_v53  ;;  %908 = vst.msk [vmem:[%s134_s17] sm:$0xff] %vm907_vm14, %v1328_v7  ;;  %909 = vst.msk [vmem:[%s134_s17 + $0x8] sm:$0xff] %vm907_vm14, %v1328_v7 }
  0x54   : > { %1106 = vmatmul.mubr.f32.vlgmr.msra.gmra.mrb[0].mxu0 %v398_v56  ;;  %v406_v63 = vand.u32 4294901760, %v314_v60  ;;  %v399_v0 = vsub.f32 %v397_v46, %v398_v56  ;;  %v280_v5 = vsel %vm276_vm7, %v275_v2, %v234_v54  ;;  %1026 = vst.msk [vmem:[%s134_s17 + $0x30] sm:$0xff] %vm907_vm14, %v1328_v7  ;;  %1027 = vst.msk [vmem:[%s134_s17 + $0x38] sm:$0xff] %vm907_vm14, %v1328_v7 }
  0x55   : > { %1150 = vmatpush3.bf16.msra.mxu0 %v1147_v25  ;;  %v285_v8 = vsel %vm281_vm11, %v280_v5, %v246_v61 }
  0x56   : > { %v407_v3 = vsub.f32 %v314_v60, %v406_v63  ;;  %v400_v4 = vand.u32 4294901760, %v399_v0  ;;  %1152 = vmatprep.subr.msk.bf16.mxu0 %vm1470_vm10, %v1329_v14  ;;  %v295_v11 = vsel %vm1518_vm13, %v285_v8, 0.0 }
  0x57   : > { %v317_v12 = vsel %vm306_vm12, %v295_v11, 0 }
  0x58   : > { %v408_v9 = vand.u32 4294901760, %v407_v3  ;;  %1076 = vmatmul.mubr.f32.vlgmr.msra.gmra.mrb[0].mxu1 %v400_v4  ;;  %v416_v15 = vand.u32 4294901760, %v317_v12 }
  0x59   : > { %1138 = vmatpush3.bf16.msra.mxu1 %v1135_v29 }
  0x5a   : > { %1108 = vmatprep.mubr.f32.mxu0 %v408_v9  ;;  %v409_v16 = vsub.f32 %v407_v3, %v408_v9  ;;  %1140 = vmatprep.subr.bf16.mxu1 %v1139_v6  ;;  %v417_v18 = vsub.f32 %v317_v12, %v416_v15 }
  0x5c   : > { %v410_v13 = vand.u32 4294901760, %v409_v16  ;;  %v418_v35 = vand.u32 4294901760, %v417_v18 }
  0x5e   : > { %1078 = vmatprep.mubr.f32.mxu1 %v410_v13  ;;  %1109 = vmatmul.mubr.f32.gmra.mrb[2].mxu0 %v418_v35  ;;  %v419_v19 = vsub.f32 %v417_v18, %v418_v35 }
  0x5f   : > { %1115 = vmatprep.mubr.f32.mxu0 %v1541_v17 }
  0x60   : > { %v420_v20 = vand.u32 4294901760, %v419_v19 }
  0x62   : > { %1079 = vmatmul.mubr.f32.gmra.mrb[2].mxu1 %v420_v20  ;;  %1116 = vmatmul.mubr.f32.vlgmr.msra.gmra.mrb[0].mxu0 %v1561_v40 }
  0x63   : > { %1085 = vmatprep.mubr.f32.mxu1 %v1541_v17  ;;  %1118 = vmatprep.mubr.f32.mxu0 %v406_v63 }
  0x64   : > { %1154 = vmatpush3.bf16.msk.msra.mxu0 %vm1470_vm10, %v1329_v14 }
  0x66   : > { %1086 = vmatmul.mubr.f32.vlgmr.msra.gmra.mrb[0].mxu1 %v1561_v40  ;;  %1119 = vmatmul.mubr.f32.gmra.mrb[2].mxu0 %v416_v15 }
  0x67   : > { %1142 = vmatpush3.bf16.msra.mxu1 %v1139_v6  ;;  %1088 = vmatprep.mubr.f32.mxu1 %v406_v63 }
  0x68   : > { %1125 = vmatprep.mubr.f32.mxu0 %v1541_v17 }
  0x6a   : > { %1089 = vmatmul.mubr.f32.gmra.mrb[2].mxu1 %v416_v15  ;;  %1126 = vmatmul.mubr.f32.vlgmr.msra.gmra.mrb[0].mxu0 %v1561_v40 }
  0x6b   : > { %1095 = vmatprep.mubr.f32.mxu1 %v1549_v27  ;;  %1128 = vmatprep.mubr.f32.mxu0 %v406_v63 }
  0x6e   : > { %1096 = vmatmul.mubr.f32.vlgmr.msra.gmra.mrb[0].mxu1 %v397_v46  ;;  %1129 = vmatmul.mubr.f32.gmra.mrb[2].mxu0 %v416_v15 }
  0x6f   : > { %1098 = vmatprep.mubr.f32.mxu1 %v407_v3 }
  0x72   : > { %1099 = vmatmul.mubr.f32.gmra.mrb[2].mxu1 %v417_v18 }
 0x13d   : > { %v1127_v10 = vpop.f32.mrb[0].mxu0 }
 0x13e   : > { %v885_v14 = vpop.f32.mrb[1].mxu0 }
 0x141   : > { %v1097_v50 = vpop.f32.mrb[0].mxu1  ;;  %v1130_v17 = vpop.f32.mrb[2].mxu0 }
 0x142   : > { %v1155_v21 = vadd.f32 %v1127_v10, %v1097_v50  ;;  %v597_v22 = vpop.f32.mrb[1].mxu1  ;;  %v897_v23 = vpop.f32.mrb[3].mxu0 }
 0x143   : > { %v1156_v24 = vadd.f32 %v885_v14, %v597_v22 }
 0x144   : > { %1023 = vst.msk [vmem:[%s134_s17 + $0x18] sm:$0xff] %vm907_vm14, %v1155_v21 }
 0x145   : > { %1022 = vst.msk [vmem:[%s134_s17 + $0x10] sm:$0xff] %vm907_vm14, %v1156_v24  ;;  %v1100_v25 = vpop.f32.mrb[2].mxu1 }
 0x146   : > { %v1157_v26 = vadd.f32 %v1130_v17, %v1100_v25  ;;  %v611_v27 = vpop.f32.mrb[3].mxu1 }
 0x147   : > { %v1158_v7 = vadd.f32 %v897_v23, %v611_v27 }
 0x148   : > { %1025 = vst.msk [vmem:[%s134_s17 + $0x28] sm:$0xff] %vm907_vm14, %v1157_v26 }
 0x149   : > { %1024 = vst.msk [vmem:[%s134_s17 + $0x20] sm:$0xff] %vm907_vm14, %v1158_v7 }
 0x14a   : > { %1270 = shalt.err (!%p1267_p2)
}
 0x14b   : > { %s1271_s13 = scalar_lea.hbm %s1615_s2, 1024  ;;  %s1275_s20 = scalar_lea.hbm %s1664_s1, 2048 }
 0x14c   : > { %p1272_p4 = scmp.ne.s32.totalorder %s1615_s2, %s1271_s13  ;;  %p1276_p9 = scmp.lt.u32.totalorder %s1615_s2, %s1664_s1 }
 0x14d   : > { %p1277_p1 = scmp.lt.u32.totalorder %s1275_s20, %s1271_s13  ;;  %p1279_p6 = scmp.lt.u32.totalorder %s1271_s13, %s1615_s2 }
 0x14e   : > { %p1273_p5 = pnand %p1272_p4, %p1677_p11 }
 0x14f   : > { %p1278_p3 = por %p1277_p1, %p1276_p9 }
 0x150   : > { %p1274_p7 = pneg %p1273_p5 }
 0x151   : > { %p1280_p12 = por %p1279_p6, %p1278_p3 }
 0x153   : > { %p1281_p13 = pnand %p1280_p12, %p1274_p7 }
 0x155   : > { %1284 = shalt.err (!%p1281_p13)
}
 0x156   : > { %s1331_s24 = smov 128   ;;  %s1332_s26 = smov 8  }
 0x157   : > { %1177 = dma.vmem_to_hbm [thread:$0]  (%p1677_p11), %s1617_s27, 1024, %s1615_s2, %s919_s10, %s1331_s24, %s1331_s24, %s1332_s26  }
 0x158 PF: > { %s947_s30 = sand.u32 1, %s1311_s6   ;;  %p1678_p8 = scmp.ne.s32.totalorder %s1669_s19, 0 }
 0x159   : > { %p1679_p10 = scmp.ge.s32.totalorder %s1323_s9, 2  ;;  %s948_s17 = scalar_lea.sflag [#allocation4], %s947_s30 }
 0x15b   : > { %p1184_p0 = pnand %p1679_p10, %p1678_p8 }
 0x15d   : > { %1306 = dma.done.wait (!%p1184_p0), %s948_s17, 1024  }
 0x15e   : > { %1308 = vsyncadd (!%p1184_p0), %s948_s17, 4294966272  ;;  %p14_p2 = scmp.ge.s32.totalorder %s1368_s12, 4   ;;  %s1680_s6 = smov %s1315_s7 }
 0x15f   : > { %s1681_s7 = smov %s1319_s8  ;;  %s1682_s8 = smov %s1380_s15 }
 0x160   : > { %s1683_s9 = smov %s1368_s12  ;;  %16 = sbr.rel (!%p14_p2) target bundleno = 5 (0x5), region = 71 }
 0x167   :  { %953 = vsyncpa [#allocation3], 1 }
 0x168   :  { %955 = vsyncpa [#allocation3 + $0x1], 1 }
 0x169   :  { %956 = vsyncpa [#allocation4], 1 }
 0x16a   :  { %958 = vsyncpa [#allocation4 + $0x1], 1 }

</bundles_post_ra>
